<compile_context>
chip_gen: v7x
topology: tpu7x:2x2x1
jax: 0.10.0
libtpu: 0.0.40
codegen_flags: <defaults>
</compile_context>

<pallas_src>
import functools

import jax
import jax.numpy as jnp
from jax.experimental import pallas as pl
from jax.experimental.pallas import tpu as pltpu

H1, H2 = 400, 300           # logical hidden sizes (match the PyTorch module)
H1_PAD, H2_PAD = 512, 384   # padded to multiples of 128 lanes
TB_MAX = 1024               # default batch tile (safe on v5e/v6e/v7x)


def _value_critic_kernel(x_ref, w1_ref, b1_ref, w2_ref, b2_ref, w3_ref, b3_ref, o_ref):
    # fc1 + ReLU : bf16 operands on the MXU, fp32 accumulation, fp32 bias add.
    h1 = jnp.dot(x_ref[...], w1_ref[...], preferred_element_type=jnp.float32)
    h1 = jnp.maximum(h1 + b1_ref[...], 0.0)
    # fc2 + ReLU
    h2 = jnp.dot(h1.astype(w2_ref.dtype), w2_ref[...],
                 preferred_element_type=jnp.float32)
    h2 = jnp.maximum(h2 + b2_ref[...], 0.0)
    # fc3 (out_features == 1): VPU multiply + lane reduction -- an N=1 MXU matmul
    # would waste 255/256 output columns. Zero-padded rows of w3 contribute nothing.
    out = jnp.sum(h2 * w3_ref[...], axis=-1, keepdims=True) + b3_ref[...]
    o_ref[...] = out.astype(o_ref.dtype)


@functools.partial(jax.jit, static_argnames=("tile_b",))
def value_critic_forward(obs, params, *, tile_b=TB_MAX):
    """Fused 3-layer MLP forward pass, batch-tiled.

    obs: (B, obs_dim) float32
    params: dict with w1 (obs_dim,400), b1 (1,400), w2 (400,300), b2 (1,300),
            w3 (300,1), b3 (1,1)  -- weights stored pre-transposed (in, out).
    returns: (B, 1) float32 value estimates.
    """
    B, obs_dim = obs.shape

    # Wrapper-side layout prep: zero-pad hidden dims to lane multiples and cast
    # the MXU operands to bf16 (biases / final row stay fp32: added after the
    # fp32 accumulation, so no precision loss).
    w1 = jnp.pad(params["w1"], ((0, 0), (0, H1_PAD - H1))).astype(jnp.bfloat16)
    b1 = jnp.pad(params["b1"], ((0, 0), (0, H1_PAD - H1)))
    w2 = jnp.pad(params["w2"],
                 ((0, H1_PAD - H1), (0, H2_PAD - H2))).astype(jnp.bfloat16)
    b2 = jnp.pad(params["b2"], ((0, 0), (0, H2_PAD - H2)))
    w3 = jnp.pad(params["w3"].T, ((0, 0), (0, H2_PAD - H2)))   # (1, H2_PAD) fp32
    b3 = params["b3"]                                          # (1, 1) fp32
    x = obs.astype(jnp.bfloat16)

    # Batch tile: full batch if it is small, else TB_MAX (multiple of 8).
    # Partial last tile: padded input rows are garbage but each output row only
    # depends on its own input row, and the padded output rows are discarded.
    tb = min(tile_b, B)
    grid = (pl.cdiv(B, tb),)

    def resident(shape):
        # Weight / bias blocks: whole array, same block every step -> stays in VMEM.
        return pl.BlockSpec(shape, lambda i: (0, 0))

    cost = pl.CostEstimate(
        flops=2 * B * (obs_dim * H1 + H1 * H2 + H2),
        transcendentals=0,
        bytes_accessed=(x.size * 2 + w1.size * 2 + w2.size * 2
                        + (b1.size + b2.size + w3.size + b3.size) * 4 + B * 4),
    )

    return pl.pallas_call(
        _value_critic_kernel,
        out_shape=jax.ShapeDtypeStruct((B, 1), jnp.float32),
        grid=grid,
        in_specs=[
            pl.BlockSpec((tb, obs_dim), lambda i: (i, 0)),  # batch-tiled, pipelined
            resident(w1.shape), resident(b1.shape),
            resident(w2.shape), resident(b2.shape),
            resident(w3.shape), resident(b3.shape),
        ],
        out_specs=pl.BlockSpec((tb, 1), lambda i: (i, 0)),
        compiler_params=pltpu.CompilerParams(
            dimension_semantics=("parallel",),      # megacore sharding on v7x
            vmem_limit_bytes=32 * 1024 * 1024,      # plenty for TB=1024 (~7 MB used)
        ),
        cost_estimate=cost,
    )(x, w1, b1, w2, b2, w3, b3)


def init_params(key, obs_dim):
    """Deterministic init mirroring the PyTorch module's __init__.

    fc1/fc2 weights: fanin_init with fanin = size[0] as in the reference code;
    fc3 weight: uniform(-0.003, 0.003). Biases use the default nn.Linear init
    uniform(-1/sqrt(in_features), 1/sqrt(in_features)).
    Weights are stored transposed: (in_features, out_features).
    """
    k1, k2, k3, kb1, kb2, kb3 = jax.random.split(key, 6)

    def uni(k, shape, bound):
        return jax.random.uniform(k, shape, jnp.float32, -bound, bound)

    w1 = uni(k1, (obs_dim, H1), 1.0 / jnp.sqrt(float(H1)))   # fanin_init, fanin=size[0]
    w2 = uni(k2, (H1, H2), 1.0 / jnp.sqrt(float(H2)))        # fanin_init, fanin=size[0]
    w3 = uni(k3, (H2, 1), 0.003)                             # uniform_(-0.003, 0.003)
    b1 = uni(kb1, (1, H1), 1.0 / jnp.sqrt(float(obs_dim)))
    b2 = uni(kb2, (1, H2), 1.0 / jnp.sqrt(float(H1)))
    b3 = uni(kb3, (1, 1), 1.0 / jnp.sqrt(float(H2)))
    return dict(w1=w1, b1=b1, w2=w2, b2=b2, w3=w3, b3=b3)


def value_critic_ref(obs, p, matmul_dtype=jnp.float32):
    """Pure-JAX reference. With matmul_dtype=bfloat16 it mirrors the kernel's
    precision choices (bf16 matmul operands, fp32 accumulation/bias, fp32 fc3)."""
    c = lambda a: a.astype(matmul_dtype).astype(jnp.float32)
    h1 = jnp.maximum(c(obs) @ c(p["w1"]) + p["b1"], 0.0)
    h2 = jnp.maximum(c(h1) @ c(p["w2"]) + p["b2"], 0.0)
    return h2 @ p["w3"] + p["b3"]


if __name__ == "__main__":
    key = jax.random.PRNGKey(0)
    k_obs, k_param = jax.random.split(key)

    batch = 8
    obs_dim = 24  # PandaReach-style observation dimension (small)
    obs = jax.random.normal(k_obs, (batch, obs_dim), jnp.float32)
    params = init_params(k_param, obs_dim)

    out = jax.block_until_ready(value_critic_forward(obs, params))

    ref_bf16 = value_critic_ref(obs, params, matmul_dtype=jnp.bfloat16)
    ref_f32 = value_critic_ref(obs, params, matmul_dtype=jnp.float32)
    assert out.shape == (batch, 1), out.shape
    assert jnp.allclose(out, ref_bf16, atol=1e-4, rtol=1e-4), "mismatch vs bf16-matched ref"
    assert jnp.allclose(out, ref_f32, atol=3e-2, rtol=3e-2), "mismatch vs fp32 ref"
    print("KERNEL_OK")
</pallas_src>

<mosaic_0001>
module attributes {stable_mosaic.version = 11 : i64} {
  func.func @_value_critic_kernel(%arg0: i32, %arg1: memref<8x24xbf16, #tpu.memory_space<vmem>>, %arg2: memref<24x512xbf16, #tpu.memory_space<vmem>>, %arg3: memref<1x512xf32, #tpu.memory_space<vmem>>, %arg4: memref<512x384xbf16, #tpu.memory_space<vmem>>, %arg5: memref<1x384xf32, #tpu.memory_space<vmem>>, %arg6: memref<1x384xf32, #tpu.memory_space<vmem>>, %arg7: memref<1x1xf32, #tpu.memory_space<vmem>>, %arg8: memref<8x1xf32, #tpu.memory_space<vmem>>) attributes {dimension_semantics = [#tpu.dimension_semantics<parallel>], iteration_bounds = array<i64: 1>, scalar_prefetch = 0 : i64, scratch_operands = 0 : i64, tpu.core_type = #tpu.core_type<tc>, window_params = [{transform_indices = @transform_0, window_bounds = array<i64: 8, 24>}, {pipeline_mode = #tpu.pipeline_mode<synchronous>, transform_indices = @transform_1, window_bounds = array<i64: 24, 512>}, {pipeline_mode = #tpu.pipeline_mode<synchronous>, transform_indices = @transform_2, window_bounds = array<i64: 1, 512>}, {pipeline_mode = #tpu.pipeline_mode<synchronous>, transform_indices = @transform_3, window_bounds = array<i64: 512, 384>}, {pipeline_mode = #tpu.pipeline_mode<synchronous>, transform_indices = @transform_4, window_bounds = array<i64: 1, 384>}, {pipeline_mode = #tpu.pipeline_mode<synchronous>, transform_indices = @transform_5, window_bounds = array<i64: 1, 384>}, {pipeline_mode = #tpu.pipeline_mode<synchronous>, transform_indices = @transform_6, window_bounds = array<i64: 1, 1>}, {transform_indices = @transform_7, window_bounds = array<i64: 8, 1>}]} {
    %c0 = arith.constant 0 : index
    %c0_0 = arith.constant 0 : index
    %0 = vector.load %arg1[%c0, %c0_0] : memref<8x24xbf16, #tpu.memory_space<vmem>>, vector<8x24xbf16>
    %c0_1 = arith.constant 0 : index
    %c0_2 = arith.constant 0 : index
    %1 = vector.load %arg2[%c0_1, %c0_2] : memref<24x512xbf16, #tpu.memory_space<vmem>>, vector<24x512xbf16>
    %cst = arith.constant dense<0.000000e+00> : vector<8x512xf32>
    %2 = tpu.matmul %0, %1, %cst {dimension_numbers = #tpu.dot_dimension_numbers<[1], [0], [0], [1], [0, 0, 1, 1], [], []>} : vector<8x24xbf16>, vector<24x512xbf16>, vector<8x512xf32> -> vector<8x512xf32>
    %c0_3 = arith.constant 0 : index
    %c0_4 = arith.constant 0 : index
    %3 = vector.load %arg3[%c0_3, %c0_4] : memref<1x512xf32, #tpu.memory_space<vmem>>, vector<1x512xf32>
    %4 = vector.broadcast %3 : vector<1x512xf32> to vector<8x512xf32>
    %5 = arith.addf %2, %4 : vector<8x512xf32>
    %cst_5 = arith.constant 0.000000e+00 : f32
    %6 = vector.broadcast %cst_5 : f32 to vector<8x512xf32>
    %7 = arith.maximumf %5, %6 : vector<8x512xf32>
    %8 = arith.truncf %7 : vector<8x512xf32> to vector<8x512xbf16>
    %c0_6 = arith.constant 0 : index
    %c0_7 = arith.constant 0 : index
    %9 = vector.load %arg4[%c0_6, %c0_7] : memref<512x384xbf16, #tpu.memory_space<vmem>>, vector<512x384xbf16>
    %cst_8 = arith.constant dense<0.000000e+00> : vector<8x384xf32>
    %10 = tpu.matmul %8, %9, %cst_8 {dimension_numbers = #tpu.dot_dimension_numbers<[1], [0], [0], [1], [0, 0, 1, 1], [], []>} : vector<8x512xbf16>, vector<512x384xbf16>, vector<8x384xf32> -> vector<8x384xf32>
    %c0_9 = arith.constant 0 : index
    %c0_10 = arith.constant 0 : index
    %11 = vector.load %arg5[%c0_9, %c0_10] : memref<1x384xf32, #tpu.memory_space<vmem>>, vector<1x384xf32>
    %12 = vector.broadcast %11 : vector<1x384xf32> to vector<8x384xf32>
    %13 = arith.addf %10, %12 : vector<8x384xf32>
    %cst_11 = arith.constant 0.000000e+00 : f32
    %14 = vector.broadcast %cst_11 : f32 to vector<8x384xf32>
    %15 = arith.maximumf %13, %14 : vector<8x384xf32>
    %c0_12 = arith.constant 0 : index
    %c0_13 = arith.constant 0 : index
    %16 = vector.load %arg6[%c0_12, %c0_13] : memref<1x384xf32, #tpu.memory_space<vmem>>, vector<1x384xf32>
    %17 = vector.broadcast %16 : vector<1x384xf32> to vector<8x384xf32>
    %18 = arith.mulf %15, %17 : vector<8x384xf32>
    %cst_14 = arith.constant dense<0.000000e+00> : vector<8xf32>
    %19 = vector.multi_reduction <add>, %18, %cst_14 [1] : vector<8x384xf32> to vector<8xf32>
    %20 = vector.shape_cast %19 : vector<8xf32> to vector<8x1xf32>
    %c0_15 = arith.constant 0 : index
    %c0_16 = arith.constant 0 : index
    %21 = vector.load %arg7[%c0_15, %c0_16] : memref<1x1xf32, #tpu.memory_space<vmem>>, vector<1x1xf32>
    %22 = vector.broadcast %21 : vector<1x1xf32> to vector<8x1xf32>
    %23 = arith.addf %20, %22 : vector<8x1xf32>
    %c0_17 = arith.constant 0 : index
    %c0_18 = arith.constant 0 : index
    %24 = vector.load %arg8[%c0_17, %c0_18] : memref<8x1xf32, #tpu.memory_space<vmem>>, vector<8x1xf32>
    tpu.vector_store %arg8[%c0_17, %c0_18], %23 {strides = array<i32>} : memref<8x1xf32, #tpu.memory_space<vmem>>, vector<8x1xf32>,
    return
  }
  func.func @transform_0(%arg0: i32) -> (i32, i32) {
    %c0_i32 = arith.constant 0 : i32
    %c0_i32_0 = arith.constant 0 : i32
    return %arg0, %c0_i32 : i32, i32
  }
  func.func @transform_1(%arg0: i32) -> (i32, i32) {
    %c0_i32 = arith.constant 0 : i32
    %c0_i32_0 = arith.constant 0 : i32
    %c0_i32_1 = arith.constant 0 : i32
    return %c0_i32, %c0_i32_0 : i32, i32
  }
  func.func @transform_2(%arg0: i32) -> (i32, i32) {
    %c0_i32 = arith.constant 0 : i32
    %c0_i32_0 = arith.constant 0 : i32
    %c0_i32_1 = arith.constant 0 : i32
    return %c0_i32, %c0_i32_0 : i32, i32
  }
  func.func @transform_3(%arg0: i32) -> (i32, i32) {
    %c0_i32 = arith.constant 0 : i32
    %c0_i32_0 = arith.constant 0 : i32
    %c0_i32_1 = arith.constant 0 : i32
    return %c0_i32, %c0_i32_0 : i32, i32
  }
  func.func @transform_4(%arg0: i32) -> (i32, i32) {
    %c0_i32 = arith.constant 0 : i32
    %c0_i32_0 = arith.constant 0 : i32
    %c0_i32_1 = arith.constant 0 : i32
    return %c0_i32, %c0_i32_0 : i32, i32
  }
  func.func @transform_5(%arg0: i32) -> (i32, i32) {
    %c0_i32 = arith.constant 0 : i32
    %c0_i32_0 = arith.constant 0 : i32
    %c0_i32_1 = arith.constant 0 : i32
    return %c0_i32, %c0_i32_0 : i32, i32
  }
  func.func @transform_6(%arg0: i32) -> (i32, i32) {
    %c0_i32 = arith.constant 0 : i32
    %c0_i32_0 = arith.constant 0 : i32
    %c0_i32_1 = arith.constant 0 : i32
    return %c0_i32, %c0_i32_0 : i32, i32
  }
  func.func @transform_7(%arg0: i32) -> (i32, i32) {
    %c0_i32 = arith.constant 0 : i32
    %c0_i32_0 = arith.constant 0 : i32
    return %arg0, %c0_i32 : i32, i32
  }
}

</mosaic_0001>

<bundles_post_ra>
// kernel: value_critic_forward.1
= control target key start
LH: loop header
LB: loop body
LE: loop exit
PB: predicated region body
PF: predicated region fallthrough
CT: control target
= control target key end

     0   :  { %v1353_v1 = vmov 0   ;;  %vm92_vm0 = vcmask 1043456   ;;  %vm88_vm1 = vcmask 195584   ;;  %vm1049_vm2 = vcmask 7168   ;;  %s1745_s1 = inlined_call_operand.vmem [shape: bf16[24,512], index: 1, kind: input, shape index: {}]   ;;  %s1746_s3 = inlined_call_operand.vmem [shape: bf16[512,384], index: 3, kind: input, shape index: {}]   ;;  %s1747_s0 = inlined_call_operand.vmem [shape: bf16[8,24], index: 0, kind: input, shape index: {}]   ;;  %s1748_s2 = inlined_call_operand.vmem [shape: f32[1,512], index: 2, kind: input, shape index: {}]   ;;  %s1749_s6 = inlined_call_operand.<no memory space> [shape: f32[1,1], index: 6, kind: input, shape index: {}]   ;;  %s1750_s4 = inlined_call_operand.vmem [shape: f32[1,384], index: 4, kind: input, shape index: {}]   ;;  %s1751_s5 = inlined_call_operand.vmem [shape: f32[1,384], index: 5, kind: input, shape index: {}]   ;;  %s1752_s7 = inlined_call_operand.vmem [shape: f32[8,1], index: 7, kind: output, shape index: {}]  }
   0x1   :  { %v1215_v0 = vld [vmem:[%s1745_s1 + $0x4] ss:$16 sps:$4 sm:$0xff]   ;;  %137 = vmatprep.mubr.bf16.mxu1 %v1353_v1  ;;  %v1217_v2 = vld [vmem:[%s1745_s1] ss:$16 sps:$4 sm:$0xff]   ;;  %v1222_v6 = vld [vmem:[%s1745_s1 + $0xc] ss:$16 sps:$4 sm:$0xff]  }
   0x2   :  { %v34_v3 = vld [vmem:[%s1745_s1 + $0x20] sm:$0xff]  ;;  %105 = vmatprep.subr.bf16.mxu1 %v1215_v0  ;;  %v35_v7 = vld [vmem:[%s1745_s1 + $0x28] sm:$0xff]  ;;  %v1233_v19 = vld [vmem:[%s1746_s3 + $0x30] ss:$12 sps:$4 sm:$0xff]   ;;  %v38_v0 = vlaneseq }
   0x3   :  { %v1060_v4 = vcombine.high %v34_v3, %v34_v3  ;;  %v1059_v5 = vcombine.low %v34_v3, %v34_v3  ;;  %106 = vmatpush1.bf16.msra.mxu1 %v1217_v2  ;;  %v1225_v9 = vld [vmem:[%s1746_s3 + $0x4] ss:$12 sps:$4 sm:$0xff]   ;;  %v1227_v10 = vld [vmem:[%s1746_s3] ss:$12 sps:$4 sm:$0xff]   ;;  %v1228_v11 = vld [vmem:[%s1746_s3 + $0x1c] ss:$12 sps:$4 sm:$0xff]   ;;  %v1062_v14 = vcombine.high %v35_v7, %v35_v7  ;;  %v1061_v15 = vcombine.low %v35_v7, %v35_v7 }
   0x4   :  { %852 = vmatprep.subr.bf16.mxu0 %v1225_v9  ;;  %v29_v12 = vld [vmem:[%s1747_s0] sm:$0xf]  ;;  %v1220_v13 = vld [vmem:[%s1745_s1 + $0x8] ss:$16 sps:$4 sm:$0xff]   ;;  %v1237_v22 = vld [vmem:[%s1746_s3 + $0x64] ss:$12 sps:$4 sm:$0xff]  }
   0x5   :  { %1063 = vmatprep.subr.msk.bf16.mxu1 %vm92_vm0, %v1060_v4  ;;  %v94_v8 = vsel %vm92_vm0, %v1059_v5, 0  ;;  %853 = vmatpush1.bf16.msra.mxu0 %v1227_v10  ;;  %v1230_v16 = vld [vmem:[%s1746_s3 + $0x18] ss:$12 sps:$4 sm:$0xff]   ;;  %v1231_v17 = vld [vmem:[%s1746_s3 + $0x34] ss:$12 sps:$4 sm:$0xff]   ;;  %v100_v18 = vsel %vm92_vm0, %v1061_v15, 0 }
   0x6   :  { %854 = vmatprep.subr.bf16.mxu0 %v1228_v11  ;;  %v1234_v20 = vld [vmem:[%s1746_s3 + $0x4c] ss:$12 sps:$4 sm:$0xff]   ;;  %v1236_v21 = vld [vmem:[%s1746_s3 + $0x48] ss:$12 sps:$4 sm:$0xff]   ;;  %v1266_v33 = vld [vmem:[%s1746_s3 + $0x110] ss:$12 sps:$4 sm:$0xff]  }
   0x7   :  { %108 = vmatpush1.bf16.msra.mxu1 %v94_v8  ;;  %v1251_v23 = vld [vmem:[%s1746_s3 + $0xc8] ss:$12 sps:$4 sm:$0xff]   ;;  %v1239_v25 = vld [vmem:[%s1746_s3 + $0x60] ss:$12 sps:$4 sm:$0xff]   ;;  %v1261_v29 = vld [vmem:[%s1746_s3 + $0xf8] ss:$12 sps:$4 sm:$0xff]  }
   0x8   :  { %146 = vmatprep.subr.bf16.mxu1 %v1222_v6  ;;  %v1253_v24 = vld [vmem:[%s1746_s3 + $0x8] ss:$12 sps:$4 sm:$0xff]   ;;  %v1256_v26 = vld [vmem:[%s1746_s3 + $0xe0] ss:$12 sps:$4 sm:$0xff]   ;;  %v1242_v30 = vld [vmem:[%s1746_s3 + $0x78] ss:$12 sps:$4 sm:$0xff]  }
   0x9   :  { %855 = vmatpush1.bf16.msra.mxu0 %v1230_v16  ;;  %v1258_v27 = vld [vmem:[%s1746_s3 + $0x20] ss:$12 sps:$4 sm:$0xff]   ;;  %v1240_v28 = vld [vmem:[%s1746_s3 + $0x7c] ss:$12 sps:$4 sm:$0xff]   ;;  %v1263_v31 = vld [vmem:[%s1746_s3 + $0x38] ss:$12 sps:$4 sm:$0xff]  }
   0xa   :  { %1064 = vmatmul.mubr.msk.bf16.vlgmr.msra.gmra.mrb[0].mxu1 %vm88_vm1, %v29_v12  ;;  %856 = vmatprep.subr.bf16.mxu0 %v1231_v17  ;;  %v1243_v32 = vld [vmem:[%s1746_s3 + $0x94] ss:$12 sps:$4 sm:$0xff]   ;;  %v1268_v34 = vld [vmem:[%s1746_s3 + $0x50] ss:$12 sps:$4 sm:$0xff]   ;;  %v1246_v36 = vld [vmem:[%s1746_s3 + $0xac] ss:$12 sps:$4 sm:$0xff]  }
   0xb   :  { %147 = vmatpush1.bf16.msra.mxu1 %v1220_v13  ;;  %178 = vmatprep.mubr.bf16.mxu1 %v1353_v1  ;;  %v1245_v35 = vld [vmem:[%s1746_s3 + $0x90] ss:$12 sps:$4 sm:$0xff]   ;;  %v1271_v37 = vld [vmem:[%s1746_s3 + $0x128] ss:$12 sps:$4 sm:$0xff]   ;;  %v1276_v40 = vld [vmem:[%s1746_s3 + $0x140] ss:$12 sps:$4 sm:$0xff]  }
   0xc   :  { %1065 = vmatprep.subr.msk.bf16.mxu1 %vm92_vm0, %v1062_v14  ;;  %v1248_v38 = vld [vmem:[%s1746_s3 + $0xa8] ss:$12 sps:$4 sm:$0xff]   ;;  %v1249_v41 = vld [vmem:[%s1746_s3 + $0xc4] ss:$12 sps:$4 sm:$0xff]   ;;  %v1252_v42 = vld [vmem:[%s1746_s3 + $0xc0] ss:$12 sps:$4 sm:$0xff]  }
   0xd   :  { %857 = vmatpush1.bf16.msra.mxu0 %v1233_v19  ;;  %v1273_v39 = vld [vmem:[%s1746_s3 + $0x68] ss:$12 sps:$4 sm:$0xff]   ;;  %v1278_v43 = vld [vmem:[%s1746_s3 + $0x80] ss:$12 sps:$4 sm:$0xff]   ;;  %v1257_v45 = vld [vmem:[%s1746_s3 + $0xd8] ss:$12 sps:$4 sm:$0xff]  }
   0xe   :  { %858 = vmatprep.subr.bf16.mxu0 %v1234_v20  ;;  %v1254_v44 = vld [vmem:[%s1746_s3 + $0xdc] ss:$12 sps:$4 sm:$0xff]   ;;  %v1259_v46 = vld [vmem:[%s1746_s3 + $0xf4] ss:$12 sps:$4 sm:$0xff]   ;;  %v1264_v48 = vld [vmem:[%s1746_s3 + $0x10c] ss:$12 sps:$4 sm:$0xff]  }
   0xf   :  { %149 = vmatpush1.bf16.msra.mxu1 %v100_v18  ;;  %v1262_v47 = vld [vmem:[%s1746_s3 + $0xf0] ss:$12 sps:$4 sm:$0xff]   ;;  %v1267_v49 = vld [vmem:[%s1746_s3 + $0x108] ss:$12 sps:$4 sm:$0xff]   ;;  %v1272_v51 = vld [vmem:[%s1746_s3 + $0x120] ss:$12 sps:$4 sm:$0xff]  }
  0x10   :  { %1164 = vmatprep.subr.bf16.mxu1 %v1251_v23  ;;  %v1269_v50 = vld [vmem:[%s1746_s3 + $0x124] ss:$12 sps:$4 sm:$0xff]   ;;  %v1274_v52 = vld [vmem:[%s1746_s3 + $0x13c] ss:$12 sps:$4 sm:$0xff]   ;;  %v1279_v54 = vld [vmem:[%s1746_s3 + $0x154] ss:$12 sps:$4 sm:$0xff]  }
  0x11   :  { %859 = vmatpush1.bf16.msra.mxu0 %v1236_v21  ;;  %v1277_v53 = vld [vmem:[%s1746_s3 + $0x138] ss:$12 sps:$4 sm:$0xff]   ;;  %v1282_v56 = vld [vmem:[%s1746_s3 + $0x150] ss:$12 sps:$4 sm:$0xff]   ;;  %v1287_v60 = vld [vmem:[%s1746_s3 + $0x168] ss:$12 sps:$4 sm:$0xff]  }
  0x12   :  { %1066 = vmatmul.mubr.msk.bf16.vlgmr.msra.gmra.mrb[4].mxu1 %vm88_vm1, %v29_v12  ;;  %860 = vmatprep.subr.bf16.mxu0 %v1237_v22  ;;  %v1281_v55 = vld [vmem:[%s1746_s3 + $0x158] ss:$12 sps:$4 sm:$0xff]   ;;  %v1286_v59 = vld [vmem:[%s1746_s3 + $0x170] ss:$12 sps:$4 sm:$0xff]   ;;  %v1292_v63 = vld [vmem:[%s1746_s3 + $0x248] ss:$12 sps:$4 sm:$0xff]  }
  0x13   :  { %1165 = vmatpush3.bf16.msra.mxu1 %v1253_v24  ;;  %v1283_v57 = vld [vmem:[%s1746_s3 + $0x98] ss:$12 sps:$4 sm:$0xff]   ;;  %v1288_v61 = vld [vmem:[%s1746_s3 + $0xb0] ss:$12 sps:$4 sm:$0xff]   ;;  %v39_v1 = vshrl.u32 %v38_v0, 7 }
  0x14   :  { %1166 = vmatprep.subr.bf16.mxu1 %v1256_v26  ;;  %v1284_v58 = vld [vmem:[%s1746_s3 + $0x16c] ss:$12 sps:$4 sm:$0xff]   ;;  %v1291_v62 = vld [vmem:[%s1746_s3 + $0x184] ss:$12 sps:$4 sm:$0xff]   ;;  %v1576_v3 = vld [vmem:[%s1748_s2] sm:$0xf] }
  0x15   :  { %861 = vmatpush1.bf16.msra.mxu0 %v1239_v25  ;;  %v1571_v2 = vsub.s32 0, %v39_v1  ;;  %v1578_v4 = vsub.s32 1, %v39_v1  ;;  %v52_v12 = vsub.s32 3, %v39_v1  ;;  %v1289_v17 = vld [vmem:[%s1746_s3 + $0x180] ss:$12 sps:$4 sm:$0xff]  }
  0x16   :  { %862 = vmatprep.subr.bf16.mxu0 %v1240_v28  ;;  %v1293_v18 = vld [vmem:[%s1746_s3 + $0x188] ss:$12 sps:$4 sm:$0xff]   ;;  %v1297_v22 = vld [vmem:[%s1746_s3 + $0x260] ss:$12 sps:$4 sm:$0xff]   ;;  %v1294_v25 = vld [vmem:[%s1746_s3 + $0x198] ss:$12 sps:$4 sm:$0xff]  }
  0x17   :  { %1167 = vmatpush3.bf16.msra.mxu1 %v1258_v27  ;;  %v41_v5 = vrot.slane %v1576_v3, %v1571_v2  ;;  %v45_v6 = vrot.slane %v1576_v3, %v1578_v4  ;;  %v53_v19 = vrot.slane %v1576_v3, %v52_v12  ;;  %v1296_v21 = vld [vmem:[%s1746_s3 + $0x19c] ss:$12 sps:$4 sm:$0xff]   ;;  %v1298_v26 = vld [vmem:[%s1746_s3 + $0x1a0] ss:$12 sps:$4 sm:$0xff]   ;;  %v1332_v0 = vld [vmem:[%s1746_s3 + $0x258] ss:$12 sps:$4 sm:$0xff]  }
  0x18   :  { %1168 = vmatprep.subr.bf16.mxu1 %v1261_v29  ;;  %v1301_v29 = vld [vmem:[%s1746_s3 + $0x1b4] ss:$12 sps:$4 sm:$0xff]   ;;  %v1347_v12 = vld [vmem:[%s1746_s3 + $0x2d0] ss:$12 sps:$4 sm:$0xff]  }
  0x19   :  { %863 = vmatpush1.bf16.msra.mxu0 %v1242_v30  ;;  %v1302_v30 = vld [vmem:[%s1746_s3 + $0x278] ss:$12 sps:$4 sm:$0xff]  }
  0x1a   :  { %864 = vmatprep.subr.bf16.mxu0 %v1243_v32 }
  0x1b   :  { %1169 = vmatpush3.bf16.msra.mxu1 %v1263_v31 }
  0x1c   :  { %1170 = vmatprep.subr.bf16.mxu1 %v1266_v33  ;;  %v1299_v33 = vld [vmem:[%s1746_s3 + $0x1b0] ss:$12 sps:$4 sm:$0xff]  }
  0x1d   :  { %865 = vmatpush1.bf16.msra.mxu0 %v1245_v35 }
  0x1e   :  { %866 = vmatprep.subr.bf16.mxu0 %v1246_v36  ;;  %v1306_v36 = vld [vmem:[%s1746_s3 + $0x1cc] ss:$12 sps:$4 sm:$0xff]  }
  0x1f   :  { %1171 = vmatpush3.bf16.msra.mxu1 %v1268_v34  ;;  %v1303_v34 = vld [vmem:[%s1746_s3 + $0x1b8] ss:$12 sps:$4 sm:$0xff]  }
  0x20   :  { %1172 = vmatprep.subr.bf16.mxu1 %v1271_v37  ;;  %v1307_v37 = vld [vmem:[%s1746_s3 + $0x290] ss:$12 sps:$4 sm:$0xff]  }
  0x21   :  { %867 = vmatpush1.bf16.msra.mxu0 %v1248_v38  ;;  %v1304_v38 = vld [vmem:[%s1746_s3 + $0x1c8] ss:$12 sps:$4 sm:$0xff]  }
  0x22   :  { %868 = vmatprep.subr.bf16.mxu0 %v1249_v41  ;;  %v1312_v41 = vld [vmem:[%s1746_s3 + $0x2a8] ss:$12 sps:$4 sm:$0xff]  }
  0x23   :  { %1173 = vmatpush3.bf16.msra.mxu1 %v1273_v39  ;;  %v1308_v39 = vld [vmem:[%s1746_s3 + $0x1d0] ss:$12 sps:$4 sm:$0xff]  }
  0x24   :  { %1174 = vmatprep.subr.bf16.mxu1 %v1276_v40  ;;  %v1311_v40 = vld [vmem:[%s1746_s3 + $0x1e4] ss:$12 sps:$4 sm:$0xff]  }
  0x25   :  { %869 = vmatpush1.bf16.msra.mxu0 %v1252_v42  ;;  %v1633_v42 = vsub.s32 2, %v39_v1  ;;  %v1337_v1 = vld [vmem:[%s1746_s3 + $0x274] ss:$12 sps:$4 sm:$0xff]  }
  0x26   :  { %870 = vmatprep.subr.bf16.mxu0 %v1254_v44  ;;  %v1313_v44 = vld [vmem:[%s1746_s3 + $0x1e8] ss:$12 sps:$4 sm:$0xff]  }
  0x27   :  { %1175 = vmatpush3.bf16.msra.mxu1 %v1278_v43  ;;  %v1309_v43 = vld [vmem:[%s1746_s3 + $0x1e0] ss:$12 sps:$4 sm:$0xff]  }
  0x28   :  { %1176 = vmatprep.subr.bf16.mxu1 %v1281_v55  ;;  %v1326_v55 = vld [vmem:[%s1746_s3 + $0x22c] ss:$12 sps:$4 sm:$0xff]  }
  0x29   :  { %871 = vmatpush1.bf16.msra.mxu0 %v1257_v45  ;;  %v1316_v45 = vld [vmem:[%s1746_s3 + $0x1fc] ss:$12 sps:$4 sm:$0xff]  }
  0x2a   :  { %872 = vmatprep.subr.bf16.mxu0 %v1259_v46  ;;  %v1317_v46 = vld [vmem:[%s1746_s3 + $0x2c0] ss:$12 sps:$4 sm:$0xff]  }
  0x2b   :  { %1177 = vmatpush3.bf16.msra.mxu1 %v1283_v57 }
  0x2c   :  { %1178 = vmatprep.subr.bf16.mxu1 %v1286_v59  ;;  %v1328_v59 = vld [vmem:[%s1746_s3 + $0x230] ss:$12 sps:$4 sm:$0xff]  }
  0x2d   :  { %873 = vmatpush1.bf16.msra.mxu0 %v1262_v47  ;;  %v49_v47 = vrot.slane %v1576_v3, %v1633_v42  ;;  %v1335_v3 = vld [vmem:[%s1746_s3 + $0x270] ss:$12 sps:$4 sm:$0xff]  }
  0x2e   :  { %874 = vmatprep.subr.bf16.mxu0 %v1264_v48  ;;  %v1314_v48 = vld [vmem:[%s1746_s3 + $0x1f8] ss:$12 sps:$4 sm:$0xff]  }
  0x2f   :  { %1179 = vmatpush3.bf16.msra.mxu1 %v1288_v61 }
  0x30   :  { %1186 = vmatprep.subr.bf16.mxu1 %v1292_v63  ;;  %v1334_v63 = vld [vmem:[%s1746_s3 + $0x25c] ss:$12 sps:$4 sm:$0xff]  }
  0x31   :  { %875 = vmatpush1.bf16.msra.mxu0 %v1267_v49  ;;  %v1318_v49 = vld [vmem:[%s1746_s3 + $0x200] ss:$12 sps:$4 sm:$0xff]  }
  0x32   :  { %876 = vmatprep.subr.bf16.mxu0 %v1269_v50  ;;  %v1321_v50 = vld [vmem:[%s1746_s3 + $0x214] ss:$12 sps:$4 sm:$0xff]  }
  0x35   :  { %877 = vmatpush1.bf16.msra.mxu0 %v1272_v51  ;;  %v1322_v51 = vld [vmem:[%s1746_s3 + $0x2d8] ss:$12 sps:$4 sm:$0xff]  }
  0x36   :  { %878 = vmatprep.subr.bf16.mxu0 %v1274_v52 }
  0x39   :  { %879 = vmatpush1.bf16.msra.mxu0 %v1277_v53  ;;  %v1319_v53 = vld [vmem:[%s1746_s3 + $0x210] ss:$12 sps:$4 sm:$0xff]  }
  0x3a   :  { %880 = vmatprep.subr.bf16.mxu0 %v1279_v54  ;;  %v1323_v54 = vld [vmem:[%s1746_s3 + $0x218] ss:$12 sps:$4 sm:$0xff]  }
  0x3d   :  { %881 = vmatpush1.bf16.msra.mxu0 %v1282_v56  ;;  %v1327_v56 = vld [vmem:[%s1746_s3 + $0x2f0] ss:$12 sps:$4 sm:$0xff]  }
  0x3e   :  { %882 = vmatprep.subr.bf16.mxu0 %v1284_v58  ;;  %v1324_v58 = vld [vmem:[%s1746_s3 + $0x228] ss:$12 sps:$4 sm:$0xff]  }
  0x41   :  { %883 = vmatpush1.bf16.msra.mxu0 %v1287_v60  ;;  %v1331_v60 = vld [vmem:[%s1746_s3 + $0x244] ss:$12 sps:$4 sm:$0xff]  }
  0x42   :  { %893 = vmatprep.subr.bf16.mxu0 %v1291_v62  ;;  %v1329_v62 = vld [vmem:[%s1746_s3 + $0x240] ss:$12 sps:$4 sm:$0xff]  }
  0xdd   :  { %v139_v7 = vpop.f32.mrb[0].mxu1 }
  0xde   :  { %v140_v8 = vadd.f32 %v139_v7, %v41_v5  ;;  %v141_v9 = vpop.f32.mrb[1].mxu1  ;;  %v1340_v5 = vld [vmem:[%s1746_s3 + $0x28c] ss:$12 sps:$4 sm:$0xff]   ;;  %v1343_v7 = vld [vmem:[%s1746_s3 + $0x2a4] ss:$12 sps:$4 sm:$0xff]  }
  0xdf   :  { %v142_v10 = vadd.f32 %v141_v9, %v45_v6  ;;  %v143_v11 = vpop.f32.mrb[2].mxu1  ;;  %v1338_v6 = vld [vmem:[%s1746_s3 + $0x288] ss:$12 sps:$4 sm:$0xff]  }
  0xe0   :  { %v187_v13 = vmax.f32 %v140_v8, 0.0  ;;  %v144_v14 = vpop.f32.mrb[3].mxu1  ;;  %v1341_v8 = vld [vmem:[%s1746_s3 + $0x2a0] ss:$12 sps:$4 sm:$0xff]   ;;  %v1346_v9 = vld [vmem:[%s1746_s3 + $0x2bc] ss:$12 sps:$4 sm:$0xff]  }
  0xe1   :  { %v188_v15 = vmax.f32 %v142_v10, 0.0  ;;  %v1344_v10 = vld [vmem:[%s1746_s3 + $0x2b8] ss:$12 sps:$4 sm:$0xff]   ;;  %v1349_v11 = vld [vmem:[%s1746_s3 + $0x2d4] ss:$12 sps:$4 sm:$0xff]  }
  0xe2   :  { %v191_v20 = vpack.c.bf16 %v187_v13, %v187_v13  ;;  %v1352_v13 = vld [vmem:[%s1746_s3 + $0x2ec] ss:$12 sps:$4 sm:$0xff]   ;;  %v1350_v14 = vld [vmem:[%s1746_s3 + $0x2e8] ss:$12 sps:$4 sm:$0xff]  }
  0xe3   :  { %v192_v16 = vpack.c.bf16 %v188_v15, %v188_v15  ;;  %v12_v15 = vstv %s1749_s6 }
  0xe4   :  { %13 = vst [vmem:[#allocation2] sm:$0x1] %v12_v15 }
  0xe5   :  { %884 = vmatprep.mubr.bf16.mxu0 %v192_v16  ;;  %966 = vmatprep.mubr.bf16.mxu1 %v192_v16  ;;  %v180_v23 = vpop.f32.mrb[4].mxu1 }
  0xe6   :  { %885 = vmatmul.mubr.bf16.vlgmr.msra.gmra.mrb[0].mxu0 %v191_v20  ;;  %967 = vmatmul.mubr.bf16.vlgmr.msra.gmra.mrb[8].mxu1 %v191_v20  ;;  %v182_v24 = vpop.f32.mrb[5].mxu1  ;;  %v181_v52 = vadd.f32 %v180_v23, %v49_v47 }
  0xe7   :  { %894 = vmatpush1.bf16.msra.mxu0 %v1289_v17  ;;  %1187 = vmatpush3.bf16.msra.mxu1 %v1293_v18  ;;  %v183_v27 = vadd.f32 %v182_v24, %v53_v19  ;;  %v184_v28 = vpop.f32.mrb[6].mxu1 }
  0xe8   :  { %895 = vmatprep.subr.bf16.mxu0 %v1296_v21  ;;  %1188 = vmatprep.subr.bf16.mxu1 %v1297_v22  ;;  %v185_v31 = vpop.f32.mrb[7].mxu1  ;;  %v189_v57 = vmax.f32 %v181_v52, 0.0  ;;  %v323_v21 = vld [vmem:[%s1750_s4] sm:$0x7] }
  0xe9   :  { %v190_v32 = vmax.f32 %v183_v27, 0.0  ;;  %v336_v22 = vrot.slane %v323_v21, %v1633_v42  ;;  %v332_v31 = vrot.slane %v323_v21, %v1578_v4 }
  0xea   :  { %v193_v61 = vpack.c.bf16 %v189_v57, %v189_v57 }
  0xeb   :  { %896 = vmatpush1.bf16.msra.mxu0 %v1294_v25  ;;  %1189 = vmatpush3.bf16.msra.mxu1 %v1298_v26  ;;  %v194_v35 = vpack.c.bf16 %v190_v32, %v190_v32 }
  0xec   :  { %897 = vmatprep.subr.bf16.mxu0 %v1301_v29  ;;  %1190 = vmatprep.subr.bf16.mxu1 %v1302_v30  ;;  %v328_v30 = vrot.slane %v323_v21, %v1571_v2 }
  0xed   :  { %1006 = vmatprep.mubr.bf16.mxu1 %v194_v35  ;;  %925 = vmatprep.mubr.bf16.mxu0 %v194_v35 }
  0xef   :  { %898 = vmatpush1.bf16.msra.mxu0 %v1299_v33  ;;  %1191 = vmatpush3.bf16.msra.mxu1 %v1303_v34  ;;  %v1017_v33 = vld [vmem:[%s1751_s5] sm:$0x7] }
  0xf0   :  { %899 = vmatprep.subr.bf16.mxu0 %v1306_v36  ;;  %1192 = vmatprep.subr.bf16.mxu1 %v1307_v37  ;;  %v1022_v35 = vrot.slane %v1017_v33, %v1571_v2 }
  0xf3   :  { %900 = vmatpush1.bf16.msra.mxu0 %v1304_v38  ;;  %1193 = vmatpush3.bf16.msra.mxu1 %v1308_v39  ;;  %v1026_v38 = vrot.slane %v1017_v33, %v1578_v4 }
  0xf4   :  { %901 = vmatprep.subr.bf16.mxu0 %v1311_v40  ;;  %1194 = vmatprep.subr.bf16.mxu1 %v1312_v41 }
  0xf7   :  { %902 = vmatpush1.bf16.msra.mxu0 %v1309_v43  ;;  %1195 = vmatpush3.bf16.msra.mxu1 %v1313_v44 }
  0xf8   :  { %903 = vmatprep.subr.bf16.mxu0 %v1316_v45  ;;  %1196 = vmatprep.subr.bf16.mxu1 %v1317_v46  ;;  %v1030_v45 = vrot.slane %v1017_v33, %v1633_v42 }
  0xfb   :  { %904 = vmatpush1.bf16.msra.mxu0 %v1314_v48  ;;  %1197 = vmatpush3.bf16.msra.mxu1 %v1318_v49 }
  0xfc   :  { %905 = vmatprep.subr.bf16.mxu0 %v1321_v50  ;;  %1198 = vmatprep.subr.bf16.mxu1 %v1322_v51  ;;  %v1163_v51 = vld [vmem:[#allocation2] ss:$0 sm:$0xff] }
  0xff   :  { %906 = vmatpush1.bf16.msra.mxu0 %v1319_v53  ;;  %1199 = vmatpush3.bf16.msra.mxu1 %v1323_v54 }
 0x100   :  { %907 = vmatprep.subr.bf16.mxu0 %v1326_v55  ;;  %1200 = vmatprep.subr.bf16.mxu1 %v1327_v56 }
 0x103   :  { %908 = vmatpush1.bf16.msra.mxu0 %v1324_v58  ;;  %1201 = vmatpush3.bf16.msra.mxu1 %v1328_v59 }
 0x104   :  { %909 = vmatprep.subr.bf16.mxu0 %v1331_v60 }
 0x106   :  { %1007 = vmatmul.mubr.bf16.vlgmr.msra.gmra.mrb[12].mxu1 %v193_v61 }
 0x107   :  { %910 = vmatpush1.bf16.msra.mxu0 %v1329_v62 }
 0x108   :  { %911 = vmatprep.subr.bf16.mxu0 %v1334_v63 }
 0x10b   :  { %912 = vmatpush1.bf16.msra.mxu0 %v1332_v0 }
 0x10c   :  { %913 = vmatprep.subr.bf16.mxu0 %v1337_v1 }
 0x10f   :  { %914 = vmatpush1.bf16.msra.mxu0 %v1335_v3 }
 0x110   :  { %915 = vmatprep.subr.bf16.mxu0 %v1340_v5 }
 0x113   :  { %916 = vmatpush1.bf16.msra.mxu0 %v1338_v6 }
 0x114   :  { %917 = vmatprep.subr.bf16.mxu0 %v1343_v7 }
 0x117   :  { %918 = vmatpush1.bf16.msra.mxu0 %v1341_v8 }
 0x118   :  { %919 = vmatprep.subr.bf16.mxu0 %v1346_v9 }
 0x11b   :  { %920 = vmatpush1.bf16.msra.mxu0 %v1344_v10 }
 0x11c   :  { %921 = vmatprep.subr.bf16.mxu0 %v1349_v11 }
 0x11f   :  { %922 = vmatpush1.bf16.msra.mxu0 %v1347_v12 }
 0x120   :  { %923 = vmatprep.subr.bf16.mxu0 %v1352_v13 }
 0x123   :  { %924 = vmatpush1.bf16.msra.mxu0 %v1350_v14 }
 0x126   :  { %926 = vmatmul.mubr.bf16.vlgmr.msra.gmra.mrb[0].mxu0 %v193_v61 }
 0x1b9   :  { %v1180_v16 = vpop.f32.mrb[8].mxu1 }
 0x1ba   :  { %v1181_v17 = vpop.f32.mrb[9].mxu1 }
 0x1bb   :  { %v1182_v18 = vadd.f32 %v1181_v17, %v1180_v16  ;;  %v1183_v19 = vpop.f32.mrb[10].mxu1 }
 0x1bc   :  { %v1184_v20 = vpop.f32.mrb[11].mxu1 }
 0x1bd   :  { %v969_v25 = vadd.f32 %v1182_v18, %v336_v22 }
 0x1d9   :  { %v1202_v23 = vpop.f32.mrb[12].mxu1 }
 0x1da   :  { %v1203_v24 = vpop.f32.mrb[13].mxu1 }
 0x1db   :  { %v1204_v26 = vadd.f32 %v1203_v24, %v1202_v23  ;;  %v1205_v27 = vpop.f32.mrb[14].mxu1 }
 0x1dc   :  { %v1206_v28 = vpop.f32.mrb[15].mxu1 }
 0x1dd   :  { %v1009_v29 = vadd.f32 %v1204_v26, %v969_v25 }
 0x1df   :  { %v1016_v43 = vmax.f32 %v1009_v29, 0.0 }
 0x1e1   :  { %v1036_v48 = vmul.f32 %v1030_v45, %v1016_v43 }
 0x1f9   :  { %v927_v32 = vpop.f32.mrb[0].mxu0 }
 0x1fa   :  { %v1208_v34 = vadd.f32 %v927_v32, %v328_v30  ;;  %v929_v36 = vpop.f32.mrb[1].mxu0 }
 0x1fb   :  { %v1209_v37 = vadd.f32 %v929_v36, %v332_v31  ;;  %v931_v39 = vpop.f32.mrb[2].mxu0 }
 0x1fc   :  { %v1014_v40 = vmax.f32 %v1208_v34, 0.0  ;;  %v932_v41 = vpop.f32.mrb[3].mxu0 }
 0x1fd   :  { %v1015_v44 = vmax.f32 %v1209_v37, 0.0 }
 0x1fe   :  { %v1034_v46 = vmul.f32 %v1022_v35, %v1014_v40 }
 0x1ff   :  { %v1035_v47 = vmul.f32 %v1026_v38, %v1015_v44 }
 0x201   :  { %v1037_v49 = vadd.f32 %v1035_v47, %v1034_v46 }
 0x203   :  { %v1038_v50 = vadd.f32 %v1037_v49, %v1036_v48 }
 0x205   :  { %1039 = vadd.xlane.f32.xlu0 %v1038_v50 }
 0x292   :  { %v1040_v52 = vpop.xlane.xlu0 %1039 }
 0x293   :  { %v1048_v2 = vadd.f32 %v1163_v51, %v1040_v52 }
 0x295   :  { %1050 = vst.msk [vmem:[%s1752_s7] sm:$0xff] %vm1049_vm2, %v1048_v2 }

</bundles_post_ra>
